<compile_context>
chip_gen: v7x
topology: tpu7x:2x2x1
jax: 0.10.0
libtpu: 0.0.40
codegen_flags: <defaults>
</compile_context>

<pallas_src>
import functools

import jax
import jax.numpy as jnp
from jax.experimental import pallas as pl
from jax.experimental.pallas import tpu as pltpu

INPUT_SIZE = 784
HIDDEN1 = 60
HIDDEN2 = 80
NUM_CLASSES = 10

# Lane-aligned (padded) hidden/output widths used inside the kernel.
H_PAD = 128     # 60 zero-padded
OUT_PAD = 128   # 10 zero-padded (lane-dense output stores)

DEFAULT_TILE_B = 1024  # ~7.5 MiB double-buffered -> fits every generation's default scoped VMEM


def _round_up(n, m):
    return ((n + m - 1) // m) * m


def mlp_kernel(x_ref, w1_ref, b1_ref, w23_ref, b23_ref, o_ref):
    # fc1 + ReLU: cast x to bf16 in-kernel (VPU, hidden under the HBM bound),
    # bf16 MXU operands, f32 accumulation, f32 bias add.
    x = x_ref[...].astype(jnp.bfloat16)
    h1 = jnp.dot(x, w1_ref[...], preferred_element_type=jnp.float32)
    h1 = jnp.maximum(h1 + b1_ref[...], 0.0)
    # Folded fc2@fc3 (single 128x128 matmul) + folded bias -> logits.
    out = jnp.dot(h1.astype(jnp.bfloat16), w23_ref[...],
                  preferred_element_type=jnp.float32)
    o_ref[...] = (out + b23_ref[...]).astype(o_ref.dtype)


def pack_params(params, compute_dtype=jnp.bfloat16):
    """Fold fc2/fc3, zero-pad to lane-dense widths, cast weights to bf16."""
    w1, b1, w2, b2, w3, b3 = params
    f32 = jnp.float32

    # fc2 and fc3 have no nonlinearity between them: fold into one layer.
    w23 = w2.astype(f32) @ w3.astype(f32)            # (60, 10), f32 fold
    b23 = b2.astype(f32) @ w3.astype(f32) + b3.astype(f32)

    def pad_w(w, rows, cols):
        out = jnp.zeros((rows, cols), compute_dtype)
        return out.at[: w.shape[0], : w.shape[1]].set(w.astype(compute_dtype))

    def pad_b(b, cols):
        out = jnp.zeros((1, cols), f32)
        return out.at[:, : b.shape[1]].set(b.astype(f32))

    return (
        pad_w(w1, INPUT_SIZE, H_PAD), pad_b(b1, H_PAD),   # (784,128) bf16, (1,128) f32
        pad_w(w23, H_PAD, OUT_PAD),   pad_b(b23, OUT_PAD) # (128,128) bf16, (1,128) f32
    )


@functools.partial(jax.jit, static_argnames=("tile_b",))
def mlp_forward(x, packed_params, tile_b=DEFAULT_TILE_B):
    w1, b1, w23, b23 = packed_params
    batch = x.shape[0]

    # Clamp the batch tile for small inputs; keep it a multiple of 8 sublanes.
    tile_b = min(tile_b, _round_up(batch, 8))
    tile_b = _round_up(tile_b, 8)

    # No batch padding: Pallas masks the remainder block (OOB reads are
    # per-row garbage that never contaminates real rows; OOB writes dropped).
    grid = (pl.cdiv(batch, tile_b),)

    flops = 2 * batch * (INPUT_SIZE * H_PAD + H_PAD * OUT_PAD)
    bytes_accessed = (
        batch * INPUT_SIZE * x.dtype.itemsize          # x, read once, unpadded
        + (INPUT_SIZE * H_PAD + H_PAD * OUT_PAD) * 2   # bf16 weights (resident)
        + (H_PAD + OUT_PAD) * 4                        # f32 biases
        + batch * OUT_PAD * 2                          # bf16 output
    )

    out = pl.pallas_call(
        mlp_kernel,
        out_shape=jax.ShapeDtypeStruct((batch, OUT_PAD), jnp.bfloat16),
        grid=grid,
        in_specs=[
            pl.BlockSpec((tile_b, INPUT_SIZE), lambda i: (i, 0)),  # x: streamed per step
            pl.BlockSpec((INPUT_SIZE, H_PAD), lambda i: (0, 0)),   # w1: resident
            pl.BlockSpec((1, H_PAD), lambda i: (0, 0)),            # b1
            pl.BlockSpec((H_PAD, OUT_PAD), lambda i: (0, 0)),      # w23 (folded fc2@fc3)
            pl.BlockSpec((1, OUT_PAD), lambda i: (0, 0)),          # b23
        ],
        out_specs=pl.BlockSpec((tile_b, OUT_PAD), lambda i: (i, 0)),
        compiler_params=pltpu.CompilerParams(
            dimension_semantics=("parallel",),
        ),
        cost_estimate=pl.CostEstimate(
            flops=flops, transcendentals=0, bytes_accessed=bytes_accessed),
    )(x, w1, b1, w23, b23)

    # Drop the class padding and return f32 logits (tiny slice; free plumbing).
    return out[:, :NUM_CLASSES].astype(jnp.float32)


def init_params(key):
    """Deterministic init mimicking nn.Linear's uniform(-1/sqrt(fan_in), +)."""
    def linear(key, fan_in, fan_out):
        kw, kb = jax.random.split(key)
        bound = 1.0 / jnp.sqrt(fan_in)
        # Stored as (in, out) so the kernel does x @ W.
        w = jax.random.uniform(kw, (fan_in, fan_out), jnp.float32, -bound, bound)
        b = jax.random.uniform(kb, (1, fan_out), jnp.float32, -bound, bound)
        return w, b

    k1, k2, k3 = jax.random.split(key, 3)
    w1, b1 = linear(k1, INPUT_SIZE, HIDDEN1)
    w2, b2 = linear(k2, HIDDEN1, HIDDEN2)
    w3, b3 = linear(k3, HIDDEN2, NUM_CLASSES)
    return (w1, b1, w2, b2, w3, b3)


def reference_forward_f32(x, params):
    """Pure f32 reference matching the PyTorch module exactly."""
    w1, b1, w2, b2, w3, b3 = params
    h1 = jnp.maximum(x @ w1 + b1, 0.0)
    h2 = h1 @ w2 + b2
    return h2 @ w3 + b3


def reference_forward_kernel_precision(x, params):
    """Mirrors the kernel's numerics: folded fc2/fc3, bf16 operands, f32 acc,
    bf16 output writeback."""
    w1, b1, w2, b2, w3, b3 = params
    bf = jnp.bfloat16
    f32 = jnp.float32
    w23 = (w2.astype(f32) @ w3.astype(f32)).astype(bf)
    b23 = b2.astype(f32) @ w3.astype(f32) + b3.astype(f32)
    h1 = jnp.dot(x.astype(bf), w1.astype(bf), preferred_element_type=f32)
    h1 = jnp.maximum(h1 + b1, 0.0)
    out = jnp.dot(h1.astype(bf), w23, preferred_element_type=f32) + b23
    return out.astype(bf).astype(f32)


if __name__ == "__main__":
    key = jax.random.PRNGKey(0)
    kx, kp = jax.random.split(key)

    batch = 64
    x = jax.random.normal(kx, (batch, INPUT_SIZE), dtype=jnp.float32)
    params = init_params(kp)
    packed = pack_params(params)

    # Default tile (clamps to the small batch -> single grid step).
    out = jax.block_until_ready(mlp_forward(x, packed))
    # Small tile to exercise the multi-step batch grid / pipelining path.
    out_multi = jax.block_until_ready(mlp_forward(x, packed, tile_b=16))
    # Non-dividing tile to exercise the masked remainder block.
    out_rem = jax.block_until_ready(mlp_forward(x, packed, tile_b=48))

    assert out.shape == (batch, NUM_CLASSES), out.shape

    ref_match = reference_forward_kernel_precision(x, params)
    ref_f32 = reference_forward_f32(x, params)
    # bf16 operands / bf16 writeback deviate from the f32 PyTorch reference;
    # the matched-precision reference is the tight check.
    assert jnp.allclose(out, ref_match, atol=2e-2, rtol=2e-2), "mismatch vs matched-precision reference"
    assert jnp.allclose(out, ref_f32, atol=1e-1, rtol=1e-1), "mismatch vs f32 reference"
    assert jnp.allclose(out_multi, out, atol=1e-5, rtol=1e-5), "tile_b=16 variation mismatch"
    assert jnp.allclose(out_rem, out, atol=1e-5, rtol=1e-5), "remainder-tile variation mismatch"

    print("KERNEL_OK")
</pallas_src>

<mosaic_0001>
module attributes {stable_mosaic.version = 11 : i64} {
  func.func @mlp_kernel(%arg0: i32, %arg1: memref<64x784xf32, #tpu.memory_space<vmem>>, %arg2: memref<784x128xbf16, #tpu.memory_space<vmem>>, %arg3: memref<1x128xf32, #tpu.memory_space<vmem>>, %arg4: memref<128x128xbf16, #tpu.memory_space<vmem>>, %arg5: memref<1x128xf32, #tpu.memory_space<vmem>>, %arg6: memref<64x128xbf16, #tpu.memory_space<vmem>>) attributes {dimension_semantics = [#tpu.dimension_semantics<parallel>], iteration_bounds = array<i64: 1>, scalar_prefetch = 0 : i64, scratch_operands = 0 : i64, tpu.core_type = #tpu.core_type<tc>, window_params = [{transform_indices = @transform_0, window_bounds = array<i64: 64, 784>}, {pipeline_mode = #tpu.pipeline_mode<synchronous>, transform_indices = @transform_1, window_bounds = array<i64: 784, 128>}, {pipeline_mode = #tpu.pipeline_mode<synchronous>, transform_indices = @transform_2, window_bounds = array<i64: 1, 128>}, {pipeline_mode = #tpu.pipeline_mode<synchronous>, transform_indices = @transform_3, window_bounds = array<i64: 128, 128>}, {pipeline_mode = #tpu.pipeline_mode<synchronous>, transform_indices = @transform_4, window_bounds = array<i64: 1, 128>}, {transform_indices = @transform_5, window_bounds = array<i64: 64, 128>}]} {
    %c0 = arith.constant 0 : index
    %c0_0 = arith.constant 0 : index
    %0 = vector.load %arg1[%c0, %c0_0] : memref<64x784xf32, #tpu.memory_space<vmem>>, vector<64x784xf32>
    %1 = arith.truncf %0 : vector<64x784xf32> to vector<64x784xbf16>
    %c0_1 = arith.constant 0 : index
    %c0_2 = arith.constant 0 : index
    %2 = vector.load %arg2[%c0_1, %c0_2] : memref<784x128xbf16, #tpu.memory_space<vmem>>, vector<784x128xbf16>
    %cst = arith.constant dense<0.000000e+00> : vector<64x128xf32>
    %3 = tpu.matmul %1, %2, %cst {dimension_numbers = #tpu.dot_dimension_numbers<[1], [0], [0], [1], [0, 0, 1, 1], [], []>} : vector<64x784xbf16>, vector<784x128xbf16>, vector<64x128xf32> -> vector<64x128xf32>
    %c0_3 = arith.constant 0 : index
    %c0_4 = arith.constant 0 : index
    %4 = vector.load %arg3[%c0_3, %c0_4] : memref<1x128xf32, #tpu.memory_space<vmem>>, vector<1x128xf32>
    %5 = vector.broadcast %4 : vector<1x128xf32> to vector<64x128xf32>
    %6 = arith.addf %3, %5 : vector<64x128xf32>
    %cst_5 = arith.constant 0.000000e+00 : f32
    %7 = vector.broadcast %cst_5 : f32 to vector<64x128xf32>
    %8 = arith.maximumf %6, %7 : vector<64x128xf32>
    %9 = arith.truncf %8 : vector<64x128xf32> to vector<64x128xbf16>
    %c0_6 = arith.constant 0 : index
    %c0_7 = arith.constant 0 : index
    %10 = vector.load %arg4[%c0_6, %c0_7] : memref<128x128xbf16, #tpu.memory_space<vmem>>, vector<128x128xbf16>
    %cst_8 = arith.constant dense<0.000000e+00> : vector<64x128xf32>
    %11 = tpu.matmul %9, %10, %cst_8 {dimension_numbers = #tpu.dot_dimension_numbers<[1], [0], [0], [1], [0, 0, 1, 1], [], []>} : vector<64x128xbf16>, vector<128x128xbf16>, vector<64x128xf32> -> vector<64x128xf32>
    %c0_9 = arith.constant 0 : index
    %c0_10 = arith.constant 0 : index
    %12 = vector.load %arg5[%c0_9, %c0_10] : memref<1x128xf32, #tpu.memory_space<vmem>>, vector<1x128xf32>
    %13 = vector.broadcast %12 : vector<1x128xf32> to vector<64x128xf32>
    %14 = arith.addf %11, %13 : vector<64x128xf32>
    %15 = arith.truncf %14 : vector<64x128xf32> to vector<64x128xbf16>
    %c0_11 = arith.constant 0 : index
    %c0_12 = arith.constant 0 : index
    %16 = vector.load %arg6[%c0_11, %c0_12] : memref<64x128xbf16, #tpu.memory_space<vmem>>, vector<64x128xbf16>
    tpu.vector_store %arg6[%c0_11, %c0_12], %15 {strides = array<i32>} : memref<64x128xbf16, #tpu.memory_space<vmem>>, vector<64x128xbf16>,
    return
  }
  func.func @transform_0(%arg0: i32) -> (i32, i32) {
    %c0_i32 = arith.constant 0 : i32
    %c0_i32_0 = arith.constant 0 : i32
    return %arg0, %c0_i32 : i32, i32
  }
  func.func @transform_1(%arg0: i32) -> (i32, i32) {
    %c0_i32 = arith.constant 0 : i32
    %c0_i32_0 = arith.constant 0 : i32
    %c0_i32_1 = arith.constant 0 : i32
    return %c0_i32, %c0_i32_0 : i32, i32
  }
  func.func @transform_2(%arg0: i32) -> (i32, i32) {
    %c0_i32 = arith.constant 0 : i32
    %c0_i32_0 = arith.constant 0 : i32
    %c0_i32_1 = arith.constant 0 : i32
    return %c0_i32, %c0_i32_0 : i32, i32
  }
  func.func @transform_3(%arg0: i32) -> (i32, i32) {
    %c0_i32 = arith.constant 0 : i32
    %c0_i32_0 = arith.constant 0 : i32
    %c0_i32_1 = arith.constant 0 : i32
    return %c0_i32, %c0_i32_0 : i32, i32
  }
  func.func @transform_4(%arg0: i32) -> (i32, i32) {
    %c0_i32 = arith.constant 0 : i32
    %c0_i32_0 = arith.constant 0 : i32
    %c0_i32_1 = arith.constant 0 : i32
    return %c0_i32, %c0_i32_0 : i32, i32
  }
  func.func @transform_5(%arg0: i32) -> (i32, i32) {
    %c0_i32 = arith.constant 0 : i32
    %c0_i32_0 = arith.constant 0 : i32
    return %arg0, %c0_i32 : i32, i32
  }
}

</mosaic_0001>

<bundles_post_ra>
// kernel: mlp_forward.1
= control target key start
LH: loop header
LB: loop body
LE: loop exit
PB: predicated region body
PF: predicated region fallthrough
CT: control target
= control target key end

     0   :  { %10 = vsyncpa [#allocation3], 0  ;;  %s1536_s0 = inlined_call_operand.hbm [shape: f32[64,784], index: 0, kind: input, shape index: {}]   ;;  %s1537_s1 = inlined_call_operand.hbm [shape: bf16[784,128], index: 1, kind: input, shape index: {}]   ;;  %s1538_s2 = inlined_call_operand.vmem [shape: f32[1,128], index: 2, kind: input, shape index: {}]   ;;  %s1539_s3 = inlined_call_operand.hbm [shape: bf16[128,128], index: 3, kind: input, shape index: {}]   ;;  %s1540_s4 = inlined_call_operand.vmem [shape: f32[1,128], index: 4, kind: input, shape index: {}]   ;;  %s1541_s5 = inlined_call_operand.vmem [shape: bf16[64,128], index: 5, kind: output, shape index: {}]  }
   0x1   :  { %11 = vsyncpa [#allocation5], 0  ;;  %s1435_s18 = smov [#allocation4]   ;;  %s1365_s22 = scalar_lea.hbm %s1537_s1, 6272 }
   0x2   :  { %s29_s19 = sshll.u32 %s1435_s18, 4  ;;  %p1366_p0 = scmp.ne.s32.totalorder %s1537_s1, %s1365_s22  ;;  %s30_s19 = int_to_ptr.vmem [resolvable:$true] %s29_s19 }
   0x3   :  { %p1369_p1 = scmp.lt.u32.totalorder %s1365_s22, %s1537_s1 }
   0x5   :  { %p1371_p2 = pnand %p1369_p1, %p1366_p0 }
   0x7   :  { %1374 = shalt.err (!%p1371_p2)
}
   0x8   :  { %s1375_s27 = scalar_lea.vmem %s30_s19, 6272  ;;  %p1380_p4 = scmp.lt.s32.totalorder %s30_s19, %s30_s19 }
   0x9   :  { %p1376_p3 = scmp.ne.s32.totalorder %s30_s19, %s1375_s27  ;;  %p1381_p5 = scmp.lt.s32.totalorder %s1375_s27, %s1375_s27 }
   0xb   :  { %p1382_p6 = por %p1381_p5, %p1380_p4 }
   0xd   :  { %p1383_p7 = pnand %p1382_p6, %p1376_p3 }
   0xf   :  { %1386 = shalt.err (!%p1383_p7)
}
  0x10   :  { %s1436_s28 = smov 64   ;;  %s1437_s29 = smov 4  }
  0x11   :  { %35 = dma.hbm_to_vmem [thread:$0]  %s1537_s1, 6272, %s30_s19, [#allocation5], %s1436_s28, %s1436_s28, %s1437_s29  }
  0x12   :  { %s1438_s7 = smov [#allocation2]   ;;  %s1387_s11 = scalar_lea.hbm %s1536_s0, 7168 }
  0x13   :  { %s17_s8 = sshll.u32 %s1438_s7, 4  ;;  %p1388_p8 = scmp.ne.s32.totalorder %s1536_s0, %s1387_s11  ;;  %s18_s8 = int_to_ptr.vmem [resolvable:$true] %s17_s8 }
  0x14   :  { %p1391_p9 = scmp.lt.u32.totalorder %s1387_s11, %s1536_s0 }
  0x16   :  { %p1393_p10 = pnand %p1391_p9, %p1388_p8 }
  0x18   :  { %1396 = shalt.err (!%p1393_p10)
}
  0x19   :  { %s1397_s16 = scalar_lea.vmem %s18_s8, 7168  ;;  %p1402_p12 = scmp.lt.s32.totalorder %s18_s8, %s18_s8 }
  0x1a   :  { %p1398_p11 = scmp.ne.s32.totalorder %s18_s8, %s1397_s16  ;;  %p1403_p13 = scmp.lt.s32.totalorder %s1397_s16, %s1397_s16 }
  0x1c   :  { %p1404_p0 = por %p1403_p13, %p1402_p12 }
  0x1e   :  { %p1405_p1 = pnand %p1404_p0, %p1398_p11 }
  0x20   :  { %1408 = shalt.err (!%p1405_p1)
}
  0x21   :  { %s1439_s1 = smov 896   ;;  %s1440_s17 = smov 56  }
  0x22   :  { %23 = dma.hbm_to_vmem [thread:$0]  %s1536_s0, 7168, %s18_s8, [#allocation3], %s1439_s1, %s1439_s1, %s1440_s17  }
  0x23   :  { %s1441_s20 = smov [#allocation6]   ;;  %s1409_s24 = scalar_lea.hbm %s1539_s3, 1024 }
  0x24   :  { %s43_s21 = sshll.u32 %s1441_s20, 4  ;;  %p1410_p2 = scmp.ne.s32.totalorder %s1539_s3, %s1409_s24  ;;  %s44_s21 = int_to_ptr.vmem [resolvable:$true] %s43_s21 }
  0x25   :  { %p1413_p3 = scmp.lt.u32.totalorder %s1409_s24, %s1539_s3 }
  0x27   :  { %p1415_p4 = pnand %p1413_p3, %p1410_p2 }
  0x29   :  { %1418 = shalt.err (!%p1415_p4)
}
  0x2a   :  { %s1419_s6 = scalar_lea.vmem %s44_s21, 1024  ;;  %p1424_p6 = scmp.lt.s32.totalorder %s44_s21, %s44_s21 }
  0x2b   :  { %p1420_p5 = scmp.ne.s32.totalorder %s44_s21, %s1419_s6  ;;  %p1425_p7 = scmp.lt.s32.totalorder %s1419_s6, %s1419_s6 }
  0x2d   :  { %p1426_p8 = por %p1425_p7, %p1424_p6 }
  0x2f   :  { %p1427_p9 = pnand %p1426_p8, %p1420_p5 }
  0x31   :  { %1430 = shalt.err (!%p1427_p9)
}
  0x32   :  { %49 = dma.hbm_to_vmem [thread:$0]  %s1539_s3, 1024, %s44_s21, [#allocation5], %s1436_s28, %s1436_s28, %s1437_s29  }
  0x33   :  { %1431 = dma.done.wait [#allocation3], 7168  }
  0x34   :  { %1432 = vsyncadd [#allocation3], 4294960128 }
  0x35   :  { %1433 = dma.done.wait [#allocation5], 7296  }
  0x36   :  { %1434 = vsyncadd [#allocation5], 4294960000  ;;  %v1308_v0 = vld [vmem:[#allocation4 + $0x40] sm:$0xff]   ;;  %v1312_v4 = vld [vmem:[#allocation4 + $0x48] sm:$0xff]   ;;  %vm545_vm0 = vcmask 130048  }
  0x37   :  { %v1309_v1 = vld [vmem:[#allocation4] sm:$0xff]   ;;  %1114 = vmatprep.subr.bf16.mxu0 %v1308_v0  ;;  %v1313_v5 = vld [vmem:[#allocation4 + $0x8] sm:$0xff]   ;;  %v1316_v8 = vld [vmem:[#allocation4 + $0x50] sm:$0xff]  }
  0x38   :  { %v1310_v2 = vld [vmem:[#allocation4 + $0xc0] sm:$0xff]   ;;  %1115 = vmatpush3.bf16.msra.mxu0 %v1309_v1  ;;  %v1314_v6 = vld [vmem:[#allocation4 + $0xc8] sm:$0xff]   ;;  %v1317_v9 = vld [vmem:[#allocation4 + $0x10] sm:$0xff]  }
  0x39   :  { %v1311_v3 = vld [vmem:[#allocation4 + $0x80] sm:$0xff]   ;;  %1154 = vmatprep.subr.bf16.mxu1 %v1310_v2  ;;  %1116 = vmatprep.subr.bf16.mxu0 %v1312_v4  ;;  %v1315_v7 = vld [vmem:[#allocation4 + $0x88] sm:$0xff]   ;;  %v1318_v10 = vld [vmem:[#allocation4 + $0xd0] sm:$0xff]  }
  0x3a   :  { %1155 = vmatpush3.bf16.msra.mxu1 %v1311_v3  ;;  %v1319_v11 = vld [vmem:[#allocation4 + $0x90] sm:$0xff]   ;;  %v1320_v12 = vld [vmem:[#allocation4 + $0x58] sm:$0xff]   ;;  %v1324_v16 = vld [vmem:[#allocation4 + $0x60] sm:$0xff]  }
  0x3b   :  { %1156 = vmatprep.subr.bf16.mxu1 %v1314_v6  ;;  %v1321_v13 = vld [vmem:[#allocation4 + $0x18] sm:$0xff]   ;;  %v1325_v17 = vld [vmem:[#allocation4 + $0x20] sm:$0xff]   ;;  %v1328_v20 = vld [vmem:[#allocation4 + $0x68] sm:$0xff]  }
  0x3c   :  { %1117 = vmatpush3.bf16.msra.mxu0 %v1313_v5  ;;  %v1322_v14 = vld [vmem:[#allocation4 + $0xd8] sm:$0xff]   ;;  %v1326_v18 = vld [vmem:[#allocation4 + $0xe0] sm:$0xff]   ;;  %v1329_v21 = vld [vmem:[#allocation4 + $0x28] sm:$0xff]  }
  0x3d   :  { %1118 = vmatprep.subr.bf16.mxu0 %v1316_v8  ;;  %v1323_v15 = vld [vmem:[#allocation4 + $0x98] sm:$0xff]   ;;  %v1327_v19 = vld [vmem:[#allocation4 + $0xa0] sm:$0xff]   ;;  %v1330_v22 = vld [vmem:[#allocation4 + $0xe8] sm:$0xff]  }
  0x3e   :  { %1157 = vmatpush3.bf16.msra.mxu1 %v1315_v7  ;;  %v1331_v23 = vld [vmem:[#allocation4 + $0xa8] sm:$0xff]   ;;  %v1332_v24 = vld [vmem:[#allocation4 + $0x70] sm:$0xff]   ;;  %v1336_v28 = vld [vmem:[#allocation4 + $0x78] sm:$0xff]  }
  0x3f   :  { %1158 = vmatprep.subr.bf16.mxu1 %v1318_v10  ;;  %v1333_v25 = vld [vmem:[#allocation4 + $0x30] sm:$0xff]   ;;  %v1337_v29 = vld [vmem:[#allocation4 + $0x38] sm:$0xff]   ;;  %v63_v31 = vld [vmem:[#allocation2 + $0x8] sm:$0xff] }
  0x40   :  { %1119 = vmatpush3.bf16.msra.mxu0 %v1317_v9  ;;  %v1334_v26 = vld [vmem:[#allocation4 + $0xf0] sm:$0xff]   ;;  %v1338_v30 = vld [vmem:[#allocation4 + $0xf8] sm:$0xff]   ;;  %v70_v32 = vld [vmem:[#allocation2 + $0x40] sm:$0xff] }
  0x41   :  { %1120 = vmatprep.subr.bf16.mxu0 %v1320_v12  ;;  %v1335_v27 = vld [vmem:[#allocation4 + $0xb0] sm:$0xff]   ;;  %v119_v33 = vpack.c.bf16 %v70_v32, %v63_v31  ;;  %v1339_v34 = vld [vmem:[#allocation4 + $0xb8] sm:$0xff]   ;;  %v62_v35 = vld [vmem:[#allocation2] sm:$0xff] }
  0x42   :  { %1159 = vmatpush3.bf16.msra.mxu1 %v1319_v11  ;;  %v69_v36 = vld [vmem:[#allocation2 + $0x38] sm:$0xff]  ;;  %v1340_v38 = vld [vmem:[#allocation4 + $0x140] sm:$0xff]   ;;  %v72_v40 = vld [vmem:[#allocation2 + $0x50] sm:$0xff] }
  0x43   :  { %1160 = vmatprep.subr.bf16.mxu1 %v1322_v14  ;;  %590 = vmatprep.mubr.bf16.mxu0 %v119_v33  ;;  %v118_v37 = vpack.c.bf16 %v69_v36, %v62_v35  ;;  %v65_v39 = vld [vmem:[#allocation2 + $0x18] sm:$0xff]  ;;  %v1341_v42 = vld [vmem:[#allocation4 + $0x100] sm:$0xff]   ;;  %v64_v43 = vld [vmem:[#allocation2 + $0x10] sm:$0xff] }
  0x44   :  { %1121 = vmatpush3.bf16.msra.mxu0 %v1321_v13  ;;  %v121_v41 = vpack.c.bf16 %v72_v40, %v65_v39  ;;  %v71_v44 = vld [vmem:[#allocation2 + $0x48] sm:$0xff]  ;;  %v77_v48 = vld [vmem:[#allocation2 + $0x78] sm:$0xff]  ;;  %v84_v49 = vld [vmem:[#allocation2 + $0xb0] sm:$0xff] }
  0x45   :  { %1122 = vmatprep.subr.bf16.mxu0 %v1324_v16  ;;  %v120_v45 = vpack.c.bf16 %v71_v44, %v64_v43  ;;  %v1342_v46 = vld [vmem:[#allocation4 + $0x148] sm:$0xff]   ;;  %v76_v50 = vld [vmem:[#allocation2 + $0x70] sm:$0xff]  ;;  %v126_v52 = vpack.c.bf16 %v84_v49, %v77_v48  ;;  %v86_v56 = vld [vmem:[#allocation2 + $0xc0] sm:$0xff] }
  0x46   :  { %1161 = vmatpush3.bf16.msra.mxu1 %v1323_v15  ;;  %655 = vmatprep.mubr.bf16.mxu1 %v121_v41  ;;  %v1343_v47 = vld [vmem:[#allocation4 + $0x108] sm:$0xff]   ;;  %v1344_v54 = vld [vmem:[#allocation4 + $0x150] sm:$0xff]   ;;  %v78_v59 = vld [vmem:[#allocation2 + $0x80] sm:$0xff] }
  0x47   :  { %1162 = vmatprep.subr.bf16.mxu1 %v1326_v18  ;;  %v83_v51 = vld [vmem:[#allocation2 + $0xa8] sm:$0xff]  ;;  %v1345_v58 = vld [vmem:[#allocation4 + $0x110] sm:$0xff]   ;;  %v85_v60 = vld [vmem:[#allocation2 + $0xb8] sm:$0xff] }
  0x48   :  { %1123 = vmatpush3.bf16.msra.mxu0 %v1325_v17  ;;  %v125_v53 = vpack.c.bf16 %v83_v51, %v76_v50  ;;  %v79_v55 = vld [vmem:[#allocation2 + $0x88] sm:$0xff]  ;;  %v127_v61 = vpack.c.bf16 %v85_v60, %v78_v59  ;;  %v1346_v62 = vld [vmem:[#allocation4 + $0x158] sm:$0xff]   ;;  %v98_v1 = vld [vmem:[#allocation2 + $0x120] sm:$0xff] }
  0x49   :  { %1124 = vmatprep.subr.bf16.mxu0 %v1328_v20  ;;  %v128_v57 = vpack.c.bf16 %v86_v56, %v79_v55  ;;  %v1347_v63 = vld [vmem:[#allocation4 + $0x118] sm:$0xff]   ;;  %v91_v0 = vld [vmem:[#allocation2 + $0xe8] sm:$0xff]  ;;  %v90_v3 = vld [vmem:[#allocation2 + $0xe0] sm:$0xff] }
  0x4a   :  { %1163 = vmatpush3.bf16.msra.mxu1 %v1327_v19  ;;  %v133_v2 = vpack.c.bf16 %v98_v1, %v91_v0  ;;  %v97_v4 = vld [vmem:[#allocation2 + $0x118] sm:$0xff]  ;;  %v1348_v5 = vld [vmem:[#allocation4 + $0x160] sm:$0xff]   ;;  %v100_v8 = vld [vmem:[#allocation2 + $0x130] sm:$0xff] }
  0x4b   :  { %1164 = vmatprep.subr.bf16.mxu1 %v1330_v22  ;;  %v93_v6 = vld [vmem:[#allocation2 + $0xf8] sm:$0xff]  ;;  %v132_v7 = vpack.c.bf16 %v97_v4, %v90_v3  ;;  %v1349_v10 = vld [vmem:[#allocation4 + $0x120] sm:$0xff]   ;;  %v92_v11 = vld [vmem:[#allocation2 + $0xf0] sm:$0xff] }
  0x4c   :  { %1125 = vmatpush3.bf16.msra.mxu0 %v1329_v21  ;;  %v135_v9 = vpack.c.bf16 %v100_v8, %v93_v6  ;;  %v99_v12 = vld [vmem:[#allocation2 + $0x128] sm:$0xff]  ;;  %v1350_v13 = vld [vmem:[#allocation4 + $0x180] sm:$0xff]   ;;  %v105_v17 = vld [vmem:[#allocation2 + $0x158] sm:$0xff] }
  0x4d   :  { %1126 = vmatprep.subr.bf16.mxu0 %v1332_v24  ;;  %v134_v14 = vpack.c.bf16 %v99_v12, %v92_v11  ;;  %v1351_v15 = vld [vmem:[#allocation4 + $0x168] sm:$0xff]   ;;  %v112_v18 = vld [vmem:[#allocation2 + $0x190] sm:$0xff]  ;;  %v114_v24 = vld [vmem:[#allocation2 + $0x1a0] sm:$0xff] }
  0x4e   :  { %1165 = vmatpush3.bf16.msra.mxu1 %v1331_v23  ;;  %v1352_v16 = vld [vmem:[#allocation4 + $0x128] sm:$0xff]   ;;  %v104_v19 = vld [vmem:[#allocation2 + $0x150] sm:$0xff]  ;;  %v140_v20 = vpack.c.bf16 %v112_v18, %v105_v17  ;;  %v1356_v33 = vld [vmem:[#allocation4 + $0x138] sm:$0xff]  }
  0x4f   :  { %1166 = vmatprep.subr.bf16.mxu1 %v1334_v26  ;;  %v111_v21 = vld [vmem:[#allocation2 + $0x188] sm:$0xff]  ;;  %v1353_v22 = vld [vmem:[#allocation4 + $0x170] sm:$0xff]   ;;  %v66_v35 = vld [vmem:[#allocation2 + $0x20] sm:$0xff] }
  0x50   :  { %1127 = vmatpush3.bf16.msra.mxu0 %v1333_v25  ;;  %v107_v23 = vld [vmem:[#allocation2 + $0x168] sm:$0xff]  ;;  %v139_v25 = vpack.c.bf16 %v111_v21, %v104_v19  ;;  %v81_v41 = vld [vmem:[#allocation2 + $0x98] sm:$0xff]  ;;  %v82_v44 = vld [vmem:[#allocation2 + $0xa0] sm:$0xff] }
  0x51   :  { %1128 = vmatprep.subr.bf16.mxu0 %v1336_v28  ;;  %v142_v26 = vpack.c.bf16 %v114_v24, %v107_v23  ;;  %v106_v28 = vld [vmem:[#allocation2 + $0x160] sm:$0xff]  ;;  %v67_v32 = vld [vmem:[#allocation2 + $0x28] sm:$0xff]  ;;  %v80_v50 = vld [vmem:[#allocation2 + $0x90] sm:$0xff] }
  0x52   :  { %1167 = vmatpush3.bf16.msra.mxu1 %v1335_v27  ;;  %v1354_v27 = vld [vmem:[#allocation4 + $0x130] sm:$0xff]   ;;  %v75_v39 = vld [vmem:[#allocation2 + $0x68] sm:$0xff]  ;;  %v110_v55 = vld [vmem:[#allocation2 + $0x180] sm:$0xff] }
  0x53   :  { %1168 = vmatprep.subr.bf16.mxu1 %v1338_v30  ;;  %v1355_v30 = vld [vmem:[#allocation4 + $0x178] sm:$0xff]   ;;  %v103_v48 = vld [vmem:[#allocation2 + $0x148] sm:$0xff]  ;;  %v94_v60 = vld [vmem:[#allocation2 + $0x100] sm:$0xff] }
  0x54   :  { %1129 = vmatpush3.bf16.msra.mxu0 %v1337_v29  ;;  %v113_v29 = vld [vmem:[#allocation2 + $0x198] sm:$0xff]  ;;  %v87_v51 = vld [vmem:[#allocation2 + $0xc8] sm:$0xff]  ;;  %v1358_v6 = vld [vmem:[#allocation6 + $0x8] sm:$0xff]  }
  0x55   :  { %1194 = vmatprep.subr.bf16.mxu0 %v1340_v38  ;;  %v141_v31 = vpack.c.bf16 %v113_v29, %v106_v28  ;;  %v68_v38 = vld [vmem:[#allocation2 + $0x30] sm:$0xff]  ;;  %v117_v56 = vld [vmem:[#allocation2 + $0x1b8] sm:$0xff]  ;;  %v115_v3 = vld [vmem:[#allocation2 + $0x1a8] sm:$0xff] }
  0x56   :  { %1169 = vmatpush3.bf16.msra.mxu1 %v1339_v34  ;;  %v74_v34 = vld [vmem:[#allocation2 + $0x60] sm:$0xff]  ;;  %v124_v40 = vpack.c.bf16 %v75_v39, %v68_v38  ;;  %v145_v59 = vpack.c.bf16 %v117_v56, %v110_v55  ;;  %v1363_v11 = vld [vmem:[#allocation6 + $0x30] sm:$0xff]  }
  0x57   :  { %591 = vmatmul.mubr.bf16.vlgmr.msra.gmra.mrb[0].mxu0 %v118_v37  ;;  %1251 = vmatprep.subr.bf16.mxu1 %v1350_v13  ;;  %v123_v36 = vpack.c.bf16 %v74_v34, %v67_v32  ;;  %v73_v37 = vld [vmem:[#allocation2 + $0x58] sm:$0xff]  ;;  %v1360_v8 = vld [vmem:[#allocation6 + $0x18] sm:$0xff]  }
  0x58   :  { %1195 = vmatpush3.bf16.msra.mxu0 %v1341_v42  ;;  %598 = vmatprep.mubr.bf16.mxu0 %v126_v52  ;;  %v88_v42 = vld [vmem:[#allocation2 + $0xd0] sm:$0xff]  ;;  %v122_v43 = vpack.c.bf16 %v73_v37, %v66_v35  ;;  %v95_v52 = vld [vmem:[#allocation2 + $0x108] sm:$0xff]  ;;  %v1364_v12 = vld [vmem:[#allocation6 + $0x38] sm:$0xff]  }
  0x59   :  { %656 = vmatmul.mubr.bf16.vlgmr.msra.gmra.mrb[0].mxu1 %v120_v45  ;;  %1196 = vmatprep.subr.bf16.mxu0 %v1342_v46  ;;  %v89_v45 = vld [vmem:[#allocation2 + $0xd8] sm:$0xff]  ;;  %v130_v46 = vpack.c.bf16 %v88_v42, %v81_v41 }
  0x5a   :  { %663 = vmatprep.mubr.bf16.mxu1 %v128_v57  ;;  %1252 = vmatpush3.bf16.msra.mxu1 %v1350_v13  ;;  %v131_v49 = vpack.c.bf16 %v89_v45, %v82_v44  ;;  %v129_v57 = vpack.c.bf16 %v87_v51, %v80_v50 }
  0x5c   :  { %1197 = vmatpush3.bf16.msra.mxu0 %v1343_v47  ;;  %v96_v47 = vld [vmem:[#allocation2 + $0x110] sm:$0xff] }
  0x5d   :  { %1198 = vmatprep.subr.bf16.mxu0 %v1344_v54  ;;  %v138_v54 = vpack.c.bf16 %v103_v48, %v96_v47 }
  0x5f   :  { %599 = vmatmul.mubr.bf16.gmra.mrb[4].mxu0 %v125_v53  ;;  %v102_v53 = vld [vmem:[#allocation2 + $0x140] sm:$0xff] }
  0x60   :  { %1199 = vmatpush3.bf16.msra.mxu0 %v1345_v58  ;;  %606 = vmatprep.mubr.bf16.mxu0 %v133_v2  ;;  %v137_v58 = vpack.c.bf16 %v102_v53, %v95_v52  ;;  %v108_v2 = vld [vmem:[#allocation2 + $0x170] sm:$0xff] }
  0x61   :  { %1200 = vmatprep.subr.bf16.mxu0 %v1346_v62  ;;  %664 = vmatmul.mubr.bf16.gmra.mrb[4].mxu1 %v127_v61  ;;  %v101_v61 = vld [vmem:[#allocation2 + $0x138] sm:$0xff]  ;;  %v143_v4 = vpack.c.bf16 %v115_v3, %v108_v2 }
  0x62   :  { %671 = vmatprep.mubr.bf16.mxu1 %v135_v9  ;;  %v109_v62 = vld [vmem:[#allocation2 + $0x178] sm:$0xff]  ;;  %v136_v0 = vpack.c.bf16 %v101_v61, %v94_v60  ;;  %v1361_v9 = vld [vmem:[#allocation6 + $0x20] sm:$0xff]  }
  0x64   :  { %1201 = vmatpush3.bf16.msra.mxu0 %v1347_v63  ;;  %v116_v63 = vld [vmem:[#allocation2 + $0x1b0] sm:$0xff] }
  0x65   :  { %1202 = vmatprep.subr.bf16.mxu0 %v1348_v5  ;;  %v144_v1 = vpack.c.bf16 %v116_v63, %v109_v62  ;;  %v1357_v5 = vld [vmem:[#allocation6] sm:$0xff]  }
  0x66   :  { %1285 = vmatprep.subr.bf16.mxu1 %v1357_v5 }
  0x67   :  { %607 = vmatmul.mubr.bf16.gmra.mrb[8].mxu0 %v132_v7  ;;  %v1359_v7 = vld [vmem:[#allocation6 + $0x10] sm:$0xff]  }
  0x68   :  { %1203 = vmatpush3.bf16.msra.mxu0 %v1349_v10  ;;  %614 = vmatprep.mubr.bf16.mxu0 %v140_v20  ;;  %v1362_v10 = vld [vmem:[#allocation6 + $0x28] sm:$0xff]  }
  0x69   :  { %1204 = vmatprep.subr.bf16.mxu0 %v1351_v15  ;;  %672 = vmatmul.mubr.bf16.gmra.mrb[8].mxu1 %v134_v14  ;;  %v1012_v14 = vld [vmem:[%s1538_s2] ss:$0 sm:$0xff] }
  0x6a   :  { %679 = vmatprep.mubr.bf16.mxu1 %v142_v26 }
  0x6c   :  { %1205 = vmatpush3.bf16.msra.mxu0 %v1352_v16 }
  0x6d   :  { %1206 = vmatprep.subr.bf16.mxu0 %v1353_v22 }
  0x6f   :  { %615 = vmatmul.mubr.bf16.gmra.mrb[12].mxu0 %v139_v25 }
  0x70   :  { %1207 = vmatpush3.bf16.msra.mxu0 %v1354_v27  ;;  %720 = vmatprep.mubr.bf16.mxu0 %v123_v36 }
  0x71   :  { %1208 = vmatprep.subr.bf16.mxu0 %v1355_v30  ;;  %680 = vmatmul.mubr.bf16.gmra.mrb[12].mxu1 %v141_v31 }
  0x72   :  { %1253 = vmatprep.mubr.msk.bf16.mxu1 %vm545_vm0, %v124_v40 }
  0x74   :  { %1209 = vmatpush3.bf16.msra.mxu0 %v1356_v33 }
  0x75   :  { %1261 = vmatprep.subr.bf16.mxu0 %v1357_v5 }
  0x77   :  { %721 = vmatmul.mubr.bf16.vlgmr.msra.gmra.mrb[16].mxu0 %v122_v43 }
  0x78   :  { %728 = vmatprep.mubr.bf16.mxu0 %v130_v46  ;;  %1262 = vmatpush3.bf16.msra.mxu0 %v1357_v5 }
  0x79   :  { %1254 = vmatmul.mubr.msk.bf16.vlgmr.msra.gmra.mrb[16].mxu1 %vm545_vm0, %v131_v49  ;;  %1263 = vmatprep.subr.bf16.mxu0 %v1358_v6 }
  0x7a   :  { %1257 = vmatprep.mubr.msk.bf16.mxu1 %vm545_vm0, %v138_v54  ;;  %1293 = vmatpush3.bf16.msra.mxu1 %v1357_v5 }
  0x7b   :  { %1286 = vmatprep.subr.bf16.mxu1 %v1358_v6 }
  0x7c   :  { %1264 = vmatpush3.bf16.msra.mxu0 %v1358_v6 }
  0x7d   :  { %1265 = vmatprep.subr.bf16.mxu0 %v1359_v7 }
  0x7e   :  { %1294 = vmatpush3.bf16.msra.mxu1 %v1358_v6 }
  0x7f   :  { %729 = vmatmul.mubr.bf16.gmra.mrb[20].mxu0 %v129_v57  ;;  %1287 = vmatprep.subr.bf16.mxu1 %v1359_v7 }
  0x80   :  { %736 = vmatprep.mubr.bf16.mxu0 %v137_v58  ;;  %1266 = vmatpush3.bf16.msra.mxu0 %v1359_v7 }
  0x81   :  { %1258 = vmatmul.mubr.msk.bf16.gmra.mrb[20].mxu1 %vm545_vm0, %v145_v59  ;;  %1267 = vmatprep.subr.bf16.mxu0 %v1360_v8 }
  0x82   :  { %1295 = vmatpush3.bf16.msra.mxu1 %v1359_v7 }
  0x83   :  { %1288 = vmatprep.subr.bf16.mxu1 %v1360_v8 }
  0x84   :  { %1268 = vmatpush3.bf16.msra.mxu0 %v1360_v8 }
  0x85   :  { %1269 = vmatprep.subr.bf16.mxu0 %v1361_v9 }
  0x86   :  { %1296 = vmatpush3.bf16.msra.mxu1 %v1360_v8 }
  0x87   :  { %737 = vmatmul.mubr.bf16.gmra.mrb[24].mxu0 %v136_v0  ;;  %1289 = vmatprep.subr.bf16.mxu1 %v1361_v9 }
  0x88   :  { %744 = vmatprep.mubr.bf16.mxu0 %v144_v1  ;;  %1270 = vmatpush3.bf16.msra.mxu0 %v1361_v9 }
  0x89   :  { %1271 = vmatprep.subr.bf16.mxu0 %v1362_v10 }
  0x8a   :  { %1297 = vmatpush3.bf16.msra.mxu1 %v1361_v9 }
  0x8b   :  { %1290 = vmatprep.subr.bf16.mxu1 %v1362_v10 }
  0x8c   :  { %1272 = vmatpush3.bf16.msra.mxu0 %v1362_v10 }
  0x8d   :  { %1273 = vmatprep.subr.bf16.mxu0 %v1363_v11 }
  0x8e   :  { %1298 = vmatpush3.bf16.msra.mxu1 %v1362_v10 }
  0x8f   :  { %745 = vmatmul.mubr.bf16.gmra.mrb[28].mxu0 %v143_v4  ;;  %1291 = vmatprep.subr.bf16.mxu1 %v1363_v11 }
  0x90   :  { %1274 = vmatpush3.bf16.msra.mxu0 %v1363_v11 }
  0x91   :  { %1275 = vmatprep.subr.bf16.mxu0 %v1364_v12 }
  0x92   :  { %1299 = vmatpush3.bf16.msra.mxu1 %v1363_v11 }
  0x93   :  { %1292 = vmatprep.subr.bf16.mxu1 %v1364_v12 }
  0x94   :  { %1276 = vmatpush3.bf16.msra.mxu0 %v1364_v12 }
  0x96   :  { %1300 = vmatpush3.bf16.msra.mxu1 %v1364_v12 }
 0x12a   :  { %v1130_v13 = vpop.f32.mrb[0].mxu0 }
 0x12b   :  { %v1131_v15 = vpop.f32.mrb[1].mxu0 }
 0x12c   :  { %v1132_v16 = vadd.f32 %v1131_v15, %v1130_v13  ;;  %v1133_v17 = vpop.f32.mrb[2].mxu0  ;;  %v1170_v18 = vpop.f32.mrb[0].mxu1 }
 0x12d   :  { %v1134_v19 = vpop.f32.mrb[3].mxu0  ;;  %v1171_v22 = vpop.f32.mrb[1].mxu1 }
 0x12e   :  { %v593_v20 = vadd.f32 %v1132_v16, %v1012_v14  ;;  %v1135_v21 = vadd.f32 %v1134_v19, %v1133_v17  ;;  %v1172_v23 = vadd.f32 %v1171_v22, %v1170_v18  ;;  %v1173_v24 = vpop.f32.mrb[2].mxu1 }
 0x12f   :  { %v1174_v26 = vpop.f32.mrb[3].mxu1 }
 0x130   :  { %v596_v25 = vadd.f32 %v1135_v21, %v1012_v14  ;;  %v658_v27 = vadd.f32 %v1172_v23, %v593_v20  ;;  %v1175_v28 = vadd.f32 %v1174_v26, %v1173_v24 }
 0x132   :  { %v1136_v29 = vpop.f32.mrb[4].mxu0  ;;  %v661_v30 = vadd.f32 %v1175_v28, %v596_v25 }
 0x133   :  { %v1137_v31 = vpop.f32.mrb[5].mxu0 }
 0x134   :  { %v1138_v32 = vadd.f32 %v1137_v31, %v1136_v29  ;;  %v1139_v33 = vpop.f32.mrb[6].mxu0  ;;  %v1176_v34 = vpop.f32.mrb[4].mxu1 }
 0x135   :  { %v1140_v35 = vpop.f32.mrb[7].mxu0  ;;  %v1177_v38 = vpop.f32.mrb[5].mxu1 }
 0x136   :  { %v601_v36 = vadd.f32 %v1138_v32, %v1012_v14  ;;  %v1141_v37 = vadd.f32 %v1140_v35, %v1139_v33  ;;  %v1178_v39 = vadd.f32 %v1177_v38, %v1176_v34  ;;  %v1179_v40 = vpop.f32.mrb[6].mxu1 }
 0x137   :  { %v1180_v42 = vpop.f32.mrb[7].mxu1 }
 0x138   :  { %v604_v41 = vadd.f32 %v1141_v37, %v1012_v14  ;;  %v666_v43 = vadd.f32 %v1178_v39, %v601_v36  ;;  %v1181_v44 = vadd.f32 %v1180_v42, %v1179_v40 }
 0x13a   :  { %v1142_v45 = vpop.f32.mrb[8].mxu0  ;;  %v669_v46 = vadd.f32 %v1181_v44, %v604_v41 }
 0x13b   :  { %v1143_v47 = vpop.f32.mrb[9].mxu0 }
 0x13c   :  { %v1144_v48 = vadd.f32 %v1143_v47, %v1142_v45  ;;  %v1145_v49 = vpop.f32.mrb[10].mxu0  ;;  %v1182_v50 = vpop.f32.mrb[8].mxu1 }
 0x13d   :  { %v1146_v51 = vpop.f32.mrb[11].mxu0  ;;  %v1183_v54 = vpop.f32.mrb[9].mxu1 }
 0x13e   :  { %v609_v52 = vadd.f32 %v1144_v48, %v1012_v14  ;;  %v1147_v53 = vadd.f32 %v1146_v51, %v1145_v49  ;;  %v1184_v55 = vadd.f32 %v1183_v54, %v1182_v50  ;;  %v1185_v56 = vpop.f32.mrb[10].mxu1 }
 0x13f   :  { %v1186_v58 = vpop.f32.mrb[11].mxu1 }
 0x140   :  { %v612_v57 = vadd.f32 %v1147_v53, %v1012_v14  ;;  %v674_v59 = vadd.f32 %v1184_v55, %v609_v52  ;;  %v1187_v60 = vadd.f32 %v1186_v58, %v1185_v56 }
 0x142   :  { %v1148_v61 = vpop.f32.mrb[12].mxu0  ;;  %v677_v62 = vadd.f32 %v1187_v60, %v612_v57 }
 0x143   :  { %v1149_v63 = vpop.f32.mrb[13].mxu0 }
 0x144   :  { %v1150_v0 = vadd.f32 %v1149_v63, %v1148_v61  ;;  %v1151_v1 = vpop.f32.mrb[14].mxu0  ;;  %v1188_v2 = vpop.f32.mrb[12].mxu1 }
 0x145   :  { %v1152_v3 = vpop.f32.mrb[15].mxu0  ;;  %v1189_v6 = vpop.f32.mrb[13].mxu1 }
 0x146   :  { %v617_v4 = vadd.f32 %v1150_v0, %v1012_v14  ;;  %v1153_v5 = vadd.f32 %v1152_v3, %v1151_v1  ;;  %v1190_v7 = vadd.f32 %v1189_v6, %v1188_v2  ;;  %v1191_v8 = vpop.f32.mrb[14].mxu1 }
 0x147   :  { %v1192_v10 = vpop.f32.mrb[15].mxu1 }
 0x148   :  { %v620_v9 = vadd.f32 %v1153_v5, %v1012_v14  ;;  %v682_v11 = vadd.f32 %v1190_v7, %v617_v4  ;;  %v1193_v12 = vadd.f32 %v1192_v10, %v1191_v8 }
 0x14a   :  { %v1210_v13 = vpop.f32.mrb[16].mxu0  ;;  %v685_v15 = vadd.f32 %v1193_v12, %v620_v9  ;;  %v1066_v12 = vld [vmem:[%s1540_s4] ss:$0 sm:$0xff] }
 0x14b   :  { %v1211_v16 = vpop.f32.mrb[17].mxu0 }
 0x14c   :  { %v1212_v17 = vadd.f32 %v1211_v16, %v1210_v13  ;;  %v1213_v18 = vpop.f32.mrb[18].mxu0  ;;  %v1255_v20 = vpop.f32.mrb[16].mxu1 }
 0x14d   :  { %v1214_v19 = vpop.f32.mrb[19].mxu0  ;;  %v787_v23 = vpop.f32.mrb[17].mxu1 }
 0x14e   :  { %v1215_v21 = vadd.f32 %v1214_v19, %v1213_v18  ;;  %v723_v22 = vadd.f32 %v1212_v17, %v658_v27  ;;  %v1256_v24 = vpop.f32.mrb[18].mxu1 }
 0x14f   :  { %v790_v28 = vpop.f32.mrb[19].mxu1 }
 0x150   :  { %v788_v25 = vadd.f32 %v787_v23, %v723_v22  ;;  %v726_v26 = vadd.f32 %v1215_v21, %v661_v30 }
 0x152   :  { %v791_v29 = vadd.f32 %v790_v28, %v726_v26  ;;  %v1216_v31 = vpop.f32.mrb[20].mxu0  ;;  %v818_v32 = vmax.f32 %v788_v25, 0.0 }
 0x153   :  { %v1217_v14 = vpop.f32.mrb[21].mxu0 }
 0x154   :  { %v819_v33 = vmax.f32 %v791_v29, 0.0  ;;  %v1218_v34 = vadd.f32 %v1217_v14, %v1216_v31  ;;  %v1219_v35 = vpop.f32.mrb[22].mxu0  ;;  %v1259_v37 = vpop.f32.mrb[20].mxu1 }
 0x155   :  { %v1220_v36 = vpop.f32.mrb[23].mxu0  ;;  %v803_v41 = vpop.f32.mrb[21].mxu1 }
 0x156   :  { %v826_v38 = vpack.c.bf16 %v819_v33, %v818_v32  ;;  %v731_v39 = vadd.f32 %v1218_v34, %v666_v43  ;;  %v1221_v40 = vadd.f32 %v1220_v36, %v1219_v35  ;;  %v1260_v42 = vpop.f32.mrb[22].mxu1 }
 0x157   :  { %v806_v45 = vpop.f32.mrb[23].mxu1 }
 0x158   :  { %v796_v27 = vadd.f32 %v1255_v20, %v731_v39  ;;  %v734_v44 = vadd.f32 %v1221_v40, %v669_v46  ;;  %1277 = vmatprep.mubr.bf16.mxu0 %v826_v38 }
 0x15a   :  { %v799_v30 = vadd.f32 %v1256_v24, %v734_v44  ;;  %v1222_v47 = vpop.f32.mrb[24].mxu0  ;;  %v820_v49 = vmax.f32 %v796_v27, 0.0 }
 0x15b   :  { %v1223_v48 = vpop.f32.mrb[25].mxu0 }
 0x15c   :  { %v821_v50 = vmax.f32 %v799_v30, 0.0  ;;  %v1224_v51 = vadd.f32 %v1223_v48, %v1222_v47  ;;  %v1225_v52 = vpop.f32.mrb[26].mxu0 }
 0x15d   :  { %v1226_v53 = vpop.f32.mrb[27].mxu0 }
 0x15e   :  { %v827_v54 = vpack.c.bf16 %v821_v50, %v820_v49  ;;  %v1227_v55 = vadd.f32 %v1226_v53, %v1225_v52  ;;  %v739_v56 = vadd.f32 %v1224_v51, %v674_v59 }
 0x160   :  { %v804_v57 = vadd.f32 %v803_v41, %v739_v56  ;;  %1278 = vmatmul.mubr.bf16.vlgmr.msra.gmra.mrb[32].mxu0 %v827_v54  ;;  %v742_v43 = vadd.f32 %v1227_v55, %v677_v62 }
 0x162   :  { %v807_v58 = vadd.f32 %v806_v45, %v742_v43  ;;  %v1228_v60 = vpop.f32.mrb[28].mxu0  ;;  %v822_v46 = vmax.f32 %v804_v57, 0.0 }
 0x163   :  { %v1229_v61 = vpop.f32.mrb[29].mxu0 }
 0x164   :  { %v823_v63 = vmax.f32 %v807_v58, 0.0  ;;  %v1230_v0 = vadd.f32 %v1229_v61, %v1228_v60  ;;  %v1231_v1 = vpop.f32.mrb[30].mxu0 }
 0x165   :  { %v1232_v2 = vpop.f32.mrb[31].mxu0 }
 0x166   :  { %v828_v3 = vpack.c.bf16 %v823_v63, %v822_v46  ;;  %v747_v4 = vadd.f32 %v1230_v0, %v682_v11  ;;  %v1233_v5 = vadd.f32 %v1232_v2, %v1231_v1 }
 0x168   :  { %v812_v6 = vadd.f32 %v1259_v37, %v747_v4  ;;  %v750_v7 = vadd.f32 %v1233_v5, %v685_v15  ;;  %1281 = vmatprep.mubr.bf16.mxu1 %v828_v3 }
 0x16a   :  { %v815_v8 = vadd.f32 %v1260_v42, %v750_v7  ;;  %v824_v9 = vmax.f32 %v812_v6, 0.0 }
 0x16c   :  { %v825_v59 = vmax.f32 %v815_v8, 0.0 }
 0x16e   :  { %v829_v10 = vpack.c.bf16 %v825_v59, %v824_v9 }
 0x170   :  { %1282 = vmatmul.mubr.bf16.vlgmr.msra.gmra.mrb[24].mxu1 %v829_v10 }
 0x233   :  { %v1279_v62 = vpop.f32.mrb[32].mxu0 }
 0x234   :  { %v935_v13 = vpop.f32.mrb[33].mxu0  ;;  %v944_v17 = vadd.f32 %v1279_v62, %v1066_v12 }
 0x235   :  { %v1280_v16 = vpop.f32.mrb[34].mxu0  ;;  %v936_v11 = vadd.f32 %v1066_v12, %v935_v13 }
 0x236   :  { %v947_v18 = vadd.f32 %v1280_v16, %v1066_v12  ;;  %v938_v19 = vpop.f32.mrb[35].mxu0 }
 0x237   :  { %v939_v20 = vadd.f32 %v1066_v12, %v938_v19 }
 0x238   :  { %v1099_v21 = vpack.c.bf16 %v947_v18, %v944_v17 }
 0x239   :  { %v1094_v15 = vpack.c.bf16 %v939_v20, %v936_v11 }
 0x23a   :  { %1111 = vst [vmem:[%s1541_s5 + $0x8] sm:$0xff] %v1099_v21  }
 0x23b   :  { %1095 = vst [vmem:[%s1541_s5] sm:$0xff] %v1094_v15  }
 0x243   :  { %v1283_v22 = vpop.f32.mrb[24].mxu1 }
 0x244   :  { %v951_v23 = vpop.f32.mrb[25].mxu1  ;;  %v960_v25 = vadd.f32 %v1283_v22, %v1066_v12 }
 0x245   :  { %v1284_v24 = vpop.f32.mrb[26].mxu1  ;;  %v952_v29 = vadd.f32 %v1066_v12, %v951_v23 }
 0x246   :  { %v963_v26 = vadd.f32 %v1284_v24, %v1066_v12  ;;  %v954_v28 = vpop.f32.mrb[27].mxu1 }
 0x247   :  { %v955_v31 = vadd.f32 %v1066_v12, %v954_v28 }
 0x248   :  { %v1109_v14 = vpack.c.bf16 %v963_v26, %v960_v25 }
 0x249   :  { %v1104_v32 = vpack.c.bf16 %v955_v31, %v952_v29 }
 0x24a   :  { %1113 = vst [vmem:[%s1541_s5 + $0x18] sm:$0xff] %v1109_v14  }
 0x24b   :  { %1112 = vst [vmem:[%s1541_s5 + $0x10] sm:$0xff] %v1104_v32  }
 0x24c   :  { %1010 = vsyncpa [#allocation3], 1 }
 0x24d   :  { %1011 = vsyncpa [#allocation5], 1 }

</bundles_post_ra>
